<compile_context>
chip_gen: v6e
topology: v6e:2x2x1
jax: 0.10.0
libtpu: 0.0.40
codegen_flags: <defaults>
</compile_context>

<pallas_src>
import functools

import jax
import jax.numpy as jnp
from jax import lax
from jax.experimental import pallas as pl
from jax.experimental.pallas import tpu as pltpu


def _round_up(x, m):
    return (x + m - 1) // m * m


def _conv3d_kernel(x_ref, w_ref, o_ref, acc_ref, *, ksize, wp, tl, nt):
    """One (batch, out-depth, spatial-tile, kd) grid step.

    x_ref  : (Cin_p, HWp_pad)        one padded depth plane, channels-first,
                                     row-major-flattened spatial (pitch Wp).
    w_ref  : (K*K, Cout_p, K*Cin_p)  composed weights, [kd*K+kh, o, kw*Cin_p+c].
    o_ref  : (Cout_p, TL)            lane-dense output tile (stride-1 flat idx).
    acc_ref: (Cout_p, TL) f32        accumulator, resident across the kd axis.
    """
    k = ksize
    kd = pl.program_id(3)

    @pl.when(kd == 0)
    def _():
        acc_ref[...] = jnp.zeros_like(acc_ref)

    if nt == 1:
        base = 0                      # fully static lane offsets
    else:
        base = pl.multiple_of(pl.program_id(2) * tl, tl)

    for kh in range(k):
        # im2col slab for this (kd, kh): fold kw taps + channels into one deep
        # contraction. Each piece is a contiguous lane-shifted slice of the
        # flat plane (sublane-tile aligned since Cin_p is a multiple of 8).
        pieces = [x_ref[:, pl.ds(base + kh * wp + kw, tl)] for kw in range(k)]
        rhs = pieces[0] if k == 1 else jnp.concatenate(pieces, axis=0)
        w_kh = w_ref[kd * k + kh]     # (Cout_p, K*Cin_p)
        acc_ref[...] += jnp.dot(w_kh, rhs, preferred_element_type=jnp.float32)

    @pl.when(kd == k - 1)
    def _():
        o_ref[...] = acc_ref[...].astype(o_ref.dtype)


def compose_full_kernel(conv_d11, conv_1d1, conv_11d):
    """okabc[o,k,a,b,c] = sum_{n,m} conv_11d[o,n,c] conv_1d1[n,m,b] conv_d11[m,k,a]."""
    A = conv_d11[:, :, :, 0, 0]    # (R, Cin, Kd)
    Bm = conv_1d1[:, :, 0, :, 0]   # (R, R,  Kh)
    C = conv_11d[:, :, 0, 0, :]    # (Cout, R, Kw)
    return jnp.einsum("onc,nmb,mka->okabc", C, Bm, A)   # (Cout, Cin, K, K, K)


def approx_conv3d(x, conv_d11, conv_1d1, conv_11d, *, kernel_size, stride=1):
    """x: (B, Cin, D, H, W) NCDHW -> (B, Cout, Do, Ho, Wo) NCDHW."""
    K = kernel_size
    pad = (K - 1) // 2
    s = stride
    B, Cin, D, H, W = x.shape
    Cout = conv_11d.shape[0]

    Dp, Hp, Wp = D + 2 * pad, H + 2 * pad, W + 2 * pad
    Do = (D + 2 * pad - K) // s + 1
    Ho = (H + 2 * pad - K) // s + 1
    Wo = (W + 2 * pad - K) // s + 1
    Hv, Wv = Hp - K + 1, Wp - K + 1            # stride-1 spatial output counts
    L = (Hv - 1) * Wp + Wv                     # valid flat output extent

    Cin_p = _round_up(Cin, 8)                  # sublane-aligned channels
    Cout_p = _round_up(Cout, 8)
    KC = K * Cin_p                             # contraction depth per dot

    # Spatial lane tile: multiple of 128, sized so the im2col slab (KC x TL f32)
    # stays comfortably within the vreg file.
    tl_budget = max(128, ((96 * 1024) // (4 * KC)) // 128 * 128)
    TL = min(512, tl_budget)
    if _round_up(L, 128) <= TL:
        TL = _round_up(L, 128)                 # single lane-dense tile if it fits
    NT = (L + TL - 1) // TL
    L_grid = NT * TL
    HWp_pad = L_grid + (K - 1) * (Wp + 1)      # >= Hp*Wp; all tap reads in-bounds

    # --- glue: compose the tiny low-rank kernel and reorder for the MXU -----
    w_full = compose_full_kernel(conv_d11, conv_1d1, conv_11d).astype(x.dtype)
    w_pad = jnp.pad(w_full, ((0, Cout_p - Cout), (0, Cin_p - Cin),
                             (0, 0), (0, 0), (0, 0)))
    # (o,c,kd,kh,kw) -> (kd,kh,o,kw,c) -> (K*K, Cout_p, K*Cin_p);
    # contraction row index = kw*Cin_p + c (matches in-kernel concat order).
    w_r = jnp.transpose(w_pad, (2, 3, 0, 4, 1)).reshape(K * K, Cout_p, KC)

    # --- input: channels-first planes, flattened row-major spatial ----------
    x_t = jnp.transpose(x, (0, 2, 1, 3, 4))                       # (B,D,Cin,H,W)
    x_t = jnp.pad(x_t, ((0, 0), (pad, pad), (0, Cin_p - Cin),
                        (pad, pad), (pad, pad)))                  # (B,Dp,Cin_p,Hp,Wp)
    x_flat = x_t.reshape(B, Dp, Cin_p, Hp * Wp)
    x_flat = jnp.pad(x_flat, ((0, 0), (0, 0), (0, 0),
                              (0, HWp_pad - Hp * Wp)))            # (B,Dp,Cin_p,HWp_pad)

    kernel = functools.partial(_conv3d_kernel, ksize=K, wp=Wp, tl=TL, nt=NT)

    itemsize = jnp.dtype(x.dtype).itemsize
    x_bytes = Cin_p * HWp_pad * itemsize
    w_bytes = K * K * Cout_p * KC * itemsize
    o_bytes = Cout_p * TL * itemsize
    acc_bytes = Cout_p * TL * 4
    vmem_need = 2 * (x_bytes + w_bytes + o_bytes) + acc_bytes + (8 << 20)
    vmem_limit = int(min(100 << 20, max(32 << 20, vmem_need)))

    out_flat = pl.pallas_call(
        kernel,
        out_shape=jax.ShapeDtypeStruct((B, Do, Cout_p, L_grid), x.dtype),
        grid_spec=pltpu.PrefetchScalarGridSpec(
            num_scalar_prefetch=0,
            grid=(B, Do, NT, K),
            in_specs=[
                # one padded depth plane per step (kd reduction axis handles
                # the depth taps; stride applied exactly here)
                pl.BlockSpec((None, None, Cin_p, HWp_pad),
                             lambda b, z, t, kd: (b, z * s + kd, 0, 0)),
                # full composed weight, constant index -> fetched once
                pl.BlockSpec((K * K, Cout_p, KC),
                             lambda b, z, t, kd: (0, 0, 0)),
            ],
            out_specs=pl.BlockSpec((None, None, Cout_p, TL),
                                   lambda b, z, t, kd: (b, z, 0, t)),
            scratch_shapes=[pltpu.VMEM((Cout_p, TL), jnp.float32)],
        ),
        compiler_params=pltpu.CompilerParams(
            dimension_semantics=("parallel", "parallel", "parallel", "arbitrary"),
            vmem_limit_bytes=vmem_limit,
        ),
    )(x_flat, w_r)

    # --- unflatten: strip channel padding, fold flat index back to (y, x) ---
    out = out_flat[:, :, :Cout, :]
    need = Hv * Wp
    if out.shape[-1] < need:
        out = jnp.pad(out, ((0, 0), (0, 0), (0, 0), (0, need - out.shape[-1])))
    out = out[..., :need].reshape(B, Do, Cout, Hv, Wp)
    out = out[:, :, :, : (Ho - 1) * s + 1 : s, : (Wo - 1) * s + 1 : s]
    return jnp.transpose(out, (0, 2, 1, 3, 4))                    # NCDHW


if __name__ == "__main__":
    key = jax.random.PRNGKey(0)
    B, Cin, Cout, R, K = 2, 4, 4, 3, 3
    D, H, W = 8, 16, 16
    stride = 1

    k1, k2, k3, k4 = jax.random.split(key, 4)
    x = jax.random.normal(k1, (B, Cin, D, H, W), jnp.float32)
    # Module __init__ uses zero-init parameters (would give an all-zero output);
    # use deterministic random values so the forward pass is exercised.
    conv_d11 = 0.1 * jax.random.normal(k2, (R, Cin, K, 1, 1), jnp.float32)
    conv_1d1 = 0.1 * jax.random.normal(k3, (R, R, 1, K, 1), jnp.float32)
    conv_11d = 0.1 * jax.random.normal(k4, (Cout, R, 1, 1, K), jnp.float32)

    out = approx_conv3d(x, conv_d11, conv_1d1, conv_11d,
                        kernel_size=K, stride=stride)
    out = jax.block_until_ready(out)

    # Reference check against XLA's conv3d with the same composed kernel.
    w_full = compose_full_kernel(conv_d11, conv_1d1, conv_11d)
    ref = lax.conv_general_dilated(
        x, w_full,
        window_strides=(stride, stride, stride),
        padding=[((K - 1) // 2, (K - 1) // 2)] * 3,
        dimension_numbers=("NCDHW", "OIDHW", "NCDHW"),
    )
    assert out.shape == ref.shape, (out.shape, ref.shape)
    assert jnp.allclose(out, ref, atol=1e-4, rtol=1e-4), \
        float(jnp.max(jnp.abs(out - ref)))

    print("KERNEL_OK")
</pallas_src>

<mosaic_0001>
module attributes {stable_mosaic.version = 11 : i64} {
  func.func @_conv3d_kernel(%arg0: i32, %arg1: i32, %arg2: i32, %arg3: i32, %arg4: memref<1x1x8x422xf32, #tpu.memory_space<vmem>>, %arg5: memref<9x8x24xf32, #tpu.memory_space<vmem>>, %arg6: memref<1x1x8x384xf32, #tpu.memory_space<vmem>>, %arg7: memref<8x384xf32, #tpu.memory_space<vmem>>) attributes {dimension_semantics = [#tpu.dimension_semantics<parallel>, #tpu.dimension_semantics<parallel>, #tpu.dimension_semantics<parallel>, #tpu.dimension_semantics<arbitrary>], iteration_bounds = array<i64: 2, 8, 1, 3>, scalar_prefetch = 0 : i64, scratch_operands = 1 : i64, tpu.core_type = #tpu.core_type<tc>, window_params = [{transform_indices = @transform_0, window_bounds = array<i64: 1, 1, 8, 422>}, {pipeline_mode = #tpu.pipeline_mode<synchronous>, transform_indices = @transform_1, window_bounds = array<i64: 9, 8, 24>}, {transform_indices = @transform_2, window_bounds = array<i64: 1, 1, 8, 384>}]} {
    %c0_i32 = arith.constant 0 : i32
    %0 = arith.cmpi eq, %arg3, %c0_i32 : i32
    %1 = arith.extui %0 : i1 to i32
    %c0_i32_0 = arith.constant 0 : i32
    %2 = arith.cmpi ne, %1, %c0_i32_0 : i32
    scf.if %2 {
      %cst_53 = arith.constant 0.000000e+00 : f32
      %54 = vector.broadcast %cst_53 : f32 to vector<8x384xf32>
      %c0_54 = arith.constant 0 : index
      %c0_55 = arith.constant 0 : index
      %55 = vector.load %arg7[%c0_54, %c0_55] : memref<8x384xf32, #tpu.memory_space<vmem>>, vector<8x384xf32>
      tpu.vector_store %arg7[%c0_54, %c0_55], %54 {strides = array<i32>} : memref<8x384xf32, #tpu.memory_space<vmem>>, vector<8x384xf32>,
    } else {
    }
    %c0 = arith.constant 0 : index
    %c0_1 = arith.constant 0 : index
    %c0_2 = arith.constant 0 : index
    %c0_3 = arith.constant 0 : index
    %3 = vector.load %arg4[%c0, %c0_1, %c0_2, %c0_3] : memref<1x1x8x422xf32, #tpu.memory_space<vmem>>, vector<1x1x8x384xf32>
    %4 = vector.shape_cast %3 : vector<1x1x8x384xf32> to vector<8x384xf32>
    %c0_4 = arith.constant 0 : index
    %c0_5 = arith.constant 0 : index
    %c0_6 = arith.constant 0 : index
    %c1 = arith.constant 1 : index
    %5 = vector.load %arg4[%c0_4, %c0_5, %c0_6, %c1] : memref<1x1x8x422xf32, #tpu.memory_space<vmem>>, vector<1x1x8x384xf32>
    %6 = vector.shape_cast %5 : vector<1x1x8x384xf32> to vector<8x384xf32>
    %c0_7 = arith.constant 0 : index
    %c0_8 = arith.constant 0 : index
    %c0_9 = arith.constant 0 : index
    %c2 = arith.constant 2 : index
    %7 = vector.load %arg4[%c0_7, %c0_8, %c0_9, %c2] : memref<1x1x8x422xf32, #tpu.memory_space<vmem>>, vector<1x1x8x384xf32>
    %8 = vector.shape_cast %7 : vector<1x1x8x384xf32> to vector<8x384xf32>
    %9 = tpu.concatenate %4, %6, %8 in 0 : vector<8x384xf32>, vector<8x384xf32>, vector<8x384xf32> -> vector<24x384xf32>
    %c3_i32 = arith.constant 3 : i32
    %10 = arith.muli %arg3, %c3_i32 : i32
    %c0_i32_10 = arith.constant 0 : i32
    %11 = arith.addi %10, %c0_i32_10 : i32
    %12 = arith.index_cast %11 : i32 to index
    %c0_11 = arith.constant 0 : index
    %c0_12 = arith.constant 0 : index
    %13 = vector.load %arg5[%12, %c0_11, %c0_12] : memref<9x8x24xf32, #tpu.memory_space<vmem>>, vector<1x8x24xf32>
    %14 = vector.shape_cast %13 : vector<1x8x24xf32> to vector<8x24xf32>
    %c0_13 = arith.constant 0 : index
    %c0_14 = arith.constant 0 : index
    %15 = vector.load %arg7[%c0_13, %c0_14] : memref<8x384xf32, #tpu.memory_space<vmem>>, vector<8x384xf32>
    %cst = arith.constant dense<0.000000e+00> : vector<8x384xf32>
    %16 = tpu.matmul %14, %9, %cst {dimension_numbers = #tpu.dot_dimension_numbers<[1], [0], [0], [1], [0, 0, 1, 1], [], []>} : vector<8x24xf32>, vector<24x384xf32>, vector<8x384xf32> -> vector<8x384xf32>
    %17 = arith.addf %15, %16 : vector<8x384xf32>
    %c0_15 = arith.constant 0 : index
    %c0_16 = arith.constant 0 : index
    %18 = vector.load %arg7[%c0_15, %c0_16] : memref<8x384xf32, #tpu.memory_space<vmem>>, vector<8x384xf32>
    tpu.vector_store %arg7[%c0_15, %c0_16], %17 {strides = array<i32>} : memref<8x384xf32, #tpu.memory_space<vmem>>, vector<8x384xf32>,
    %c0_17 = arith.constant 0 : index
    %c0_18 = arith.constant 0 : index
    %c0_19 = arith.constant 0 : index
    %c18 = arith.constant 18 : index
    %19 = vector.load %arg4[%c0_17, %c0_18, %c0_19, %c18] : memref<1x1x8x422xf32, #tpu.memory_space<vmem>>, vector<1x1x8x384xf32>
    %20 = vector.shape_cast %19 : vector<1x1x8x384xf32> to vector<8x384xf32>
    %c0_20 = arith.constant 0 : index
    %c0_21 = arith.constant 0 : index
    %c0_22 = arith.constant 0 : index
    %c19 = arith.constant 19 : index
    %21 = vector.load %arg4[%c0_20, %c0_21, %c0_22, %c19] : memref<1x1x8x422xf32, #tpu.memory_space<vmem>>, vector<1x1x8x384xf32>
    %22 = vector.shape_cast %21 : vector<1x1x8x384xf32> to vector<8x384xf32>
    %c0_23 = arith.constant 0 : index
    %c0_24 = arith.constant 0 : index
    %c0_25 = arith.constant 0 : index
    %c20 = arith.constant 20 : index
    %23 = vector.load %arg4[%c0_23, %c0_24, %c0_25, %c20] : memref<1x1x8x422xf32, #tpu.memory_space<vmem>>, vector<1x1x8x384xf32>
    %24 = vector.shape_cast %23 : vector<1x1x8x384xf32> to vector<8x384xf32>
    %25 = tpu.concatenate %20, %22, %24 in 0 : vector<8x384xf32>, vector<8x384xf32>, vector<8x384xf32> -> vector<24x384xf32>
    %c3_i32_26 = arith.constant 3 : i32
    %26 = arith.muli %arg3, %c3_i32_26 : i32
    %c1_i32 = arith.constant 1 : i32
    %27 = arith.addi %26, %c1_i32 : i32
    %28 = arith.index_cast %27 : i32 to index
    %c0_27 = arith.constant 0 : index
    %c0_28 = arith.constant 0 : index
    %29 = vector.load %arg5[%28, %c0_27, %c0_28] : memref<9x8x24xf32, #tpu.memory_space<vmem>>, vector<1x8x24xf32>
    %30 = vector.shape_cast %29 : vector<1x8x24xf32> to vector<8x24xf32>
    %c0_29 = arith.constant 0 : index
    %c0_30 = arith.constant 0 : index
    %31 = vector.load %arg7[%c0_29, %c0_30] : memref<8x384xf32, #tpu.memory_space<vmem>>, vector<8x384xf32>
    %cst_31 = arith.constant dense<0.000000e+00> : vector<8x384xf32>
    %32 = tpu.matmul %30, %25, %cst_31 {dimension_numbers = #tpu.dot_dimension_numbers<[1], [0], [0], [1], [0, 0, 1, 1], [], []>} : vector<8x24xf32>, vector<24x384xf32>, vector<8x384xf32> -> vector<8x384xf32>
    %33 = arith.addf %31, %32 : vector<8x384xf32>
    %c0_32 = arith.constant 0 : index
    %c0_33 = arith.constant 0 : index
    %34 = vector.load %arg7[%c0_32, %c0_33] : memref<8x384xf32, #tpu.memory_space<vmem>>, vector<8x384xf32>
    tpu.vector_store %arg7[%c0_32, %c0_33], %33 {strides = array<i32>} : memref<8x384xf32, #tpu.memory_space<vmem>>, vector<8x384xf32>,
    %c0_34 = arith.constant 0 : index
    %c0_35 = arith.constant 0 : index
    %c0_36 = arith.constant 0 : index
    %c36 = arith.constant 36 : index
    %35 = vector.load %arg4[%c0_34, %c0_35, %c0_36, %c36] : memref<1x1x8x422xf32, #tpu.memory_space<vmem>>, vector<1x1x8x384xf32>
    %36 = vector.shape_cast %35 : vector<1x1x8x384xf32> to vector<8x384xf32>
    %c0_37 = arith.constant 0 : index
    %c0_38 = arith.constant 0 : index
    %c0_39 = arith.constant 0 : index
    %c37 = arith.constant 37 : index
    %37 = vector.load %arg4[%c0_37, %c0_38, %c0_39, %c37] : memref<1x1x8x422xf32, #tpu.memory_space<vmem>>, vector<1x1x8x384xf32>
    %38 = vector.shape_cast %37 : vector<1x1x8x384xf32> to vector<8x384xf32>
    %c0_40 = arith.constant 0 : index
    %c0_41 = arith.constant 0 : index
    %c0_42 = arith.constant 0 : index
    %c38 = arith.constant 38 : index
    %39 = vector.load %arg4[%c0_40, %c0_41, %c0_42, %c38] : memref<1x1x8x422xf32, #tpu.memory_space<vmem>>, vector<1x1x8x384xf32>
    %40 = vector.shape_cast %39 : vector<1x1x8x384xf32> to vector<8x384xf32>
    %41 = tpu.concatenate %36, %38, %40 in 0 : vector<8x384xf32>, vector<8x384xf32>, vector<8x384xf32> -> vector<24x384xf32>
    %c3_i32_43 = arith.constant 3 : i32
    %42 = arith.muli %arg3, %c3_i32_43 : i32
    %c2_i32 = arith.constant 2 : i32
    %43 = arith.addi %42, %c2_i32 : i32
    %44 = arith.index_cast %43 : i32 to index
    %c0_44 = arith.constant 0 : index
    %c0_45 = arith.constant 0 : index
    %45 = vector.load %arg5[%44, %c0_44, %c0_45] : memref<9x8x24xf32, #tpu.memory_space<vmem>>, vector<1x8x24xf32>
    %46 = vector.shape_cast %45 : vector<1x8x24xf32> to vector<8x24xf32>
    %c0_46 = arith.constant 0 : index
    %c0_47 = arith.constant 0 : index
    %47 = vector.load %arg7[%c0_46, %c0_47] : memref<8x384xf32, #tpu.memory_space<vmem>>, vector<8x384xf32>
    %cst_48 = arith.constant dense<0.000000e+00> : vector<8x384xf32>
    %48 = tpu.matmul %46, %41, %cst_48 {dimension_numbers = #tpu.dot_dimension_numbers<[1], [0], [0], [1], [0, 0, 1, 1], [], []>} : vector<8x24xf32>, vector<24x384xf32>, vector<8x384xf32> -> vector<8x384xf32>
    %49 = arith.addf %47, %48 : vector<8x384xf32>
    %c0_49 = arith.constant 0 : index
    %c0_50 = arith.constant 0 : index
    %50 = vector.load %arg7[%c0_49, %c0_50] : memref<8x384xf32, #tpu.memory_space<vmem>>, vector<8x384xf32>
    tpu.vector_store %arg7[%c0_49, %c0_50], %49 {strides = array<i32>} : memref<8x384xf32, #tpu.memory_space<vmem>>, vector<8x384xf32>,
    %c2_i32_51 = arith.constant 2 : i32
    %51 = arith.cmpi eq, %arg3, %c2_i32_51 : i32
    %52 = arith.extui %51 : i1 to i32
    %c0_i32_52 = arith.constant 0 : i32
    %53 = arith.cmpi ne, %52, %c0_i32_52 : i32
    scf.if %53 {
      %c0_53 = arith.constant 0 : index
      %c0_54 = arith.constant 0 : index
      %54 = vector.load %arg7[%c0_53, %c0_54] : memref<8x384xf32, #tpu.memory_space<vmem>>, vector<8x384xf32>
      %c0_55 = arith.constant 0 : index
      %c0_56 = arith.constant 0 : index
      %c0_57 = arith.constant 0 : index
      %c0_58 = arith.constant 0 : index
      %55 = vector.load %arg6[%c0_55, %c0_56, %c0_57, %c0_58] : memref<1x1x8x384xf32, #tpu.memory_space<vmem>>, vector<1x1x8x384xf32>
      %56 = vector.shape_cast %55 : vector<1x1x8x384xf32> to vector<8x384xf32>
      %57 = vector.shape_cast %54 : vector<8x384xf32> to vector<1x1x8x384xf32>
      tpu.vector_store %arg6[%c0_55, %c0_56, %c0_57, %c0_58], %57 {strides = array<i32>} : memref<1x1x8x384xf32, #tpu.memory_space<vmem>>, vector<1x1x8x384xf32>,
    } else {
    }
    return
  }
  func.func @transform_0(%arg0: i32, %arg1: i32, %arg2: i32, %arg3: i32) -> (i32, i32, i32, i32) {
    %c1_i32 = arith.constant 1 : i32
    %0 = arith.muli %arg1, %c1_i32 : i32
    %1 = arith.addi %0, %arg3 : i32
    %c0_i32 = arith.constant 0 : i32
    %c0_i32_0 = arith.constant 0 : i32
    %c0_i32_1 = arith.constant 0 : i32
    return %arg0, %1, %c0_i32, %c0_i32_0 : i32, i32, i32, i32
  }
  func.func @transform_1(%arg0: i32, %arg1: i32, %arg2: i32, %arg3: i32) -> (i32, i32, i32) {
    %c0_i32 = arith.constant 0 : i32
    %c0_i32_0 = arith.constant 0 : i32
    %c0_i32_1 = arith.constant 0 : i32
    %c0_i32_2 = arith.constant 0 : i32
    return %c0_i32, %c0_i32_0, %c0_i32_1 : i32, i32, i32
  }
  func.func @transform_2(%arg0: i32, %arg1: i32, %arg2: i32, %arg3: i32) -> (i32, i32, i32, i32) {
    %c0_i32 = arith.constant 0 : i32
    %c0_i32_0 = arith.constant 0 : i32
    return %arg0, %arg1, %c0_i32, %arg2 : i32, i32, i32, i32
  }
}

</mosaic_0001>

<bundles_post_ra>
// kernel: tpu_custom_call.1
= control target key start
LH: loop header
LB: loop body
LE: loop exit
PB: predicated region body
PF: predicated region fallthrough
CT: control target
= control target key end

     0   :  { %s1852_s0 = inlined_call_operand.hbm [shape: f32[2,10,8,422], index: 0, kind: input, shape index: {}]   ;;  %s1853_s1 = inlined_call_operand.hbm [shape: f32[9,8,24], index: 1, kind: input, shape index: {}]   ;;  %s1854_s2 = inlined_call_operand.hbm [shape: f32[2,8,8,384], index: 2, kind: output, shape index: {}]  }
   0x1   :  { %1865 = sst [smem:[#allocation21_spill]] %s1853_s1 }
   0x2   :  { %1866 = sst [smem:[#allocation22_spill]] %s1854_s2 }
   0x3   :  { %7 = vsyncpa [#allocation4], 0 }
   0x4   :  { %9 = vsyncpa [#allocation4 + $0x1], 0 }
   0x5   :  { %10 = vsyncpa [#allocation7], 0 }
   0x6   :  { %11 = vsyncpa [#allocation5], 0 }
   0x7   :  { %13 = vsyncpa [#allocation5 + $0x1], 0  ;;  %s1456_s9 = smov 0   ;;  %s1458_s10 = smov 0  }
   0x8   :  { %s1460_s11 = smov 0   ;;  %s1462_s12 = smov 0  }
   0x9   :  { %s1464_s13 = smov 0   ;;  %s1466_s14 = smov 0  }
   0xa   :  { %s1468_s15 = smov 0   ;;  %s1470_s16 = smov 0  }
   0xb   :  { %s1472_s17 = smov 0   ;;  %s1474_s18 = smov 0  }
   0xc   :  { %s1476_s19 = smov 0   ;;  %s1478_s20 = smov 0  }
   0xd   :  { %s1480_s21 = smov 0  }
   0xe LB: > { %1867 = sst [smem:[#allocation12_spill]] %s1379_s9  ;;  %s1025_s22 = sadd.s32 4294967295, %s1427_s21   ;;  %s1427_s21 = sphi %s1480_s21, %s19_s21   ;;  %s1423_s20 = sphi %s1478_s20, %s1906_s20   ;;  %s1419_s19 = sphi %s1476_s19, %s1905_s19   ;;  %s1415_s18 = sphi %s1474_s18, %s1896_s18   ;;  %s1411_s17 = sphi %s1472_s17, %s1904_s17   ;;  %s1407_s16 = sphi %s1470_s16, %s1895_s16   ;;  %s1403_s15 = sphi %s1468_s15, %s1894_s15   ;;  %s1399_s14 = sphi %s1466_s14, %s1903_s14   ;;  %s1395_s13 = sphi %s1464_s13, %s1902_s13   ;;  %s1391_s12 = sphi %s1462_s12, %s1901_s12   ;;  %s1387_s11 = sphi %s1460_s11, %s1900_s11   ;;  %s1383_s10 = sphi %s1458_s10, %s1899_s10   ;;  %s1379_s9 = sphi %s1456_s9, %s1898_s9  }
   0xf   : > { %1868 = sst [smem:[#allocation13_spill]] %s1407_s16  ;;  %s1026_s23 = sadd.s32 4294967294, %s1427_s21  }
  0x10   : > { %1869 = sst [smem:[#allocation14_spill]] %s1411_s17  ;;  %p69_p0 = scmp.ne.s32.totalorder %s1395_s13, %s1391_s12 }
  0x11   : > { %1870 = sst [smem:[#allocation15_spill]] %s1415_s18  ;;  %p1522_p1 = scmp.eq.s32.totalorder %s1025_s22, 0 }
  0x12   : > { %1871 = sst [smem:[#allocation16_spill]] %s1419_s19  ;;  %p117_p2 = scmp.ne.s32.totalorder %s1387_s11, %s1383_s10 }
  0x13   : > { %p118_p3 = scmp.eq.s32.totalorder %s1025_s22, 47  ;;  %p1530_p4 = por %p1522_p1, %p69_p0 }
  0x14   : > { %p123_p5 = scmp.ne.s32.totalorder %s1383_s10, %s1379_s9  ;;  %p124_p7 = scmp.eq.s32.totalorder %s1026_s23, 47 }
  0x15   : > { %p1536_p6 = por %p118_p3, %p117_p2  ;;  %p1027_p8 = scmp.ge.s32.totalorder %s1427_s21, 1 }
  0x16   : > { %p131_p9 = scmp.lt.s32.totalorder %s1427_s21, 49  ;;  %p1542_p10 = por %p124_p7, %p123_p5 }
  0x17   : > { %s1874_s26 = scalar_select %p1536_p6, 1, 0 }
  0x18   : > { %s1876_s27 = scalar_select %p1542_p10, 1, 0 }
  0x19   : > { %1875 = sst [smem:[#allocation17_spill]] %s1874_s26  ;;  %p1546_p11 = pnand %p1027_p8, %p131_p9 }
  0x1a   : > { %1877 = sst [smem:[#allocation18_spill]] %s1876_s27  ;;  %s1429_s29 = smov [#allocation6]  }
  0x1b   : > { %s143_s30 = sshll.u32 %s1429_s29, 4  ;;  %p1103_p12 = pneg %p1546_p11  ;;  %s144_s30 = int_to_ptr.vmem [resolvable:$true] %s143_s30 }
  0x1c   : > { %s1244_s3 = scalar_lea.vmem %s144_s30, 1152  ;;  %p1252_p7 = scmp.lt.s32.totalorder %s144_s30, %s144_s30 }
  0x1d   : > { %p1104_p13 = pnand %p1103_p12, %p1522_p1  ;;  %p1245_p2 = scmp.ne.s32.totalorder %s144_s30, %s1244_s3 }
  0x1e   : > { %p1253_p6 = scmp.lt.s32.totalorder %s1244_s3, %s1244_s3 }
  0x1f   : > { %p1235_p0 = pneg %p1104_p13 }
  0x20   : > { %p1254_p10 = por %p1253_p6, %p1252_p7 }
  0x21   : > { %p1247_p3 = pnand %p1245_p2, %p1235_p0 }
  0x23   : > { %p1248_p5 = pneg %p1247_p3 }
  0x25   : > { %p1255_p8 = pnand %p1254_p10, %p1248_p5 }
  0x27   : > { %1258 = shalt.err (!%p1255_p8)
}
  0x28   : > { %s1430_s4 = smov 128   ;;  %s1431_s5 = smov 8  }
  0x29   : > { %s1879_s1 = sld [smem:[#allocation21_spill]]  ;;  %s34_s8 = sadd.s32 1, %s1415_s18 }
  0x2a   : > { %s41_s12 = sadd.s32 1, %s1419_s19  ;;  %p35_p6 = scmp.ge.s32.totalorder %s34_s8, 3 }
  0x2b   : > { %s45_s22 = sadd.s32 1, %s1423_s20  ;;  %s1562_s23 = sadd.s32 %s1415_s18, %s1419_s19 }
  0x2c   : > { %s56_s29 = sadd.s32 1, %s1399_s14  ;;  %s1908_s8 = smov (%p35_p6, %s34_s8), 0 }
  0x2d   : > { %1880 = sst [smem:[#allocation19_spill]] %s1908_s8  ;;  %s1910_s12 = smov (!%p35_p6, %s41_s12), %s1419_s19 }
  0x2e   : > { %p63_p9 = scmp.ne.s32.totalorder %s1399_s14, %s1395_s13  ;;  %p64_p10 = scmp.eq.s32.totalorder %s1427_s21, 0 }
  0x2f   : > { %1106 = dma.hbm_to_vmem [thread:$0]  (!%p1104_p13), %s1879_s1, 1152, %s144_s30, [#allocation7], %s1430_s4, %s1430_s4, %s1431_s5  }
  0x30   : > { %p43_p12 = scmp.ge.s32.totalorder %s1910_s12, 8  ;;  %s107_s30 = sadd.s32 1, %s1387_s11 }
  0x31   : > { %p1572_p13 = por %p64_p10, %p63_p9  ;;  %p1116_p0 = scmp.lt.s32.totalorder %s1427_s21, 48 }
  0x32   : > { %s1912_s12 = smov (%p43_p12, %s1910_s12), 0  ;;  %s1914_s22 = smov (!%p43_p12, %s45_s22), %s1423_s20 }
  0x33   : > { %1882 = sst [smem:[#allocation20_spill]] %s1912_s12  ;;  %s50_s4 = sadd.s32 %s1912_s12, %s1908_s8 }
  0x34   : > { %s101_s5 = ssub.s32 %s1419_s19, %s1912_s12  ;;  %p47_p2 = scmp.ge.s32.totalorder %s1914_s22, 2 }
  0x35   : > { %s52_s6 = ssub.s32 %s1562_s23, %s50_s4  ;;  %s157_s7 = sand.u32 1, %s1399_s14  }
  0x36   : > { %s1031_s1 = sshll.u32 %s1562_s23, 2  ;;  %s1916_s22 = smov (%p47_p2, %s1914_s22), 0 }
  0x37   : > { %s1030_s18 = sshll.u32 %s157_s7, 5  ;;  %s51_s27 = ssub.s32 %s1423_s20, %s1916_s22 }
  0x38   : > { %s53_s9 = sor.u32 %s52_s6, %s51_s27  ;;  %s102_s2 = sor.u32 %s101_s5, %s51_s27 }
  0x39   : > { %p54_p3 = scmp.eq.s32.totalorder %s53_s9, 0  ;;  %p105_p5 = scmp.eq.s32.totalorder %s102_s2, 0 }
  0x3a   : > { %s1091_s26 = smul.u32 40, %s1423_s20  ;;  %s161_s8 = scalar_lea.vmem [#allocation3], %s1030_s18 }
  0x3b   : > { %s172_s17 = sshll.u32 %s161_s8, 4  ;;  %p1602_p7 = pnand %p1116_p0, %p1572_p13  ;;  %s173_s17 = int_to_ptr.vmem [resolvable:$true] %s172_s17 }
  0x3c   : > { %s1593_s12 = scalar_select %p54_p3, %s1399_s14, %s56_s29  }
  0x3d   : > { %s1596_s19 = scalar_select %p105_p5, %s1387_s11, %s107_s30  }
  0x3e   : > { %s168_s4 = sadd.s32 %s1091_s26, %s1031_s1  ;;  %s158_s9 = scalar_lea.sflag [#allocation4], %s157_s7 }
  0x3f   : > { %s1032_s23 = sshll.u32 %s168_s4, 7  ;;  %p1261_p8 = pneg %p1602_p7 }
  0x40   : > { %s170_s2 = scalar_lea.hbm %s1852_s0, %s1032_s23  ;;  %s1272_s18 = scalar_lea.vmem %s173_s17, 512 }
  0x41   : > { %p1273_p6 = scmp.ne.s32.totalorder %s173_s17, %s1272_s18  ;;  %s1432_s1 = smov [#allocation3]  }
  0x42   : > { %s1277_s26 = sshll.u32 %s1432_s1, 4  ;;  %s1278_s26 = int_to_ptr.vmem [resolvable:$false] %s1277_s26 }
  0x43   : > { %p1275_p9 = pnand %p1273_p6, %p1261_p8  ;;  %s1279_s8 = scalar_lea.vmem %s1278_s26, 1024 }
  0x44   : > { %p1280_p12 = scmp.lt.s32.totalorder %s173_s17, %s1278_s26  ;;  %p1281_p13 = scmp.lt.s32.totalorder %s1279_s8, %s1272_s18 }
  0x45   : > { %p1276_p10 = pneg %p1275_p9 }
  0x46   : > { %p1282_p0 = por %p1281_p13, %p1280_p12 }
  0x48   : > { %p1283_p2 = pnand %p1282_p0, %p1276_p10 }
  0x4a   : > { %1286 = shalt.err (!%p1283_p2)
}
  0x4b   : > { %1110 = dma.hbm_to_vmem [thread:$0]  (!%p1602_p7), %s170_s2, 512, %s173_s17, %s158_s9  }
  0x4c   : > { %181 = sbr.rel (%p1546_p11) target bundleno = 609 (0x261), region = 28  ;;  %s183_s29 = sand.u32 (!%p1546_p11), 1, %s1395_s13  }
  0x4d   : > { %s1034_s30 = sshll.u32 (!%p1546_p11), %s183_s29, 5  ;;  %s184_s3 = scalar_lea.sflag (!%p1546_p11), [#allocation4], %s183_s29 }
  0x4e   : > { %s187_s5 = scalar_lea.vmem (!%p1546_p11), [#allocation3], %s1034_s30 }
  0x51   : > { %1366 = dma.done.wait (%p1530_p4), %s184_s3, 512  }
  0x52   : > { %1368 = vsyncadd (%p1530_p4), %s184_s3, 4294966784 }
  0x53   : > { %1370 = dma.done.wait (%p1522_p1), [#allocation7], 1152  }
  0x54   : > { %1372 = vsyncadd (%p1522_p1), [#allocation7], 4294966144  ;;  %s209_s16 = sand.u32 1, %s1383_s10   ;;  %p1036_p11 = scmp.ne.s32.totalorder %s1403_s15, 0 }
  0x55   : > { %s1092_s17 = smul.u32 24, %s209_s16 }
  0x56   : > { %217 = sbr.rel (%p1036_p11) target bundleno = 94 (0x5e), region = 40 }
  0x57   : > { %s1627_s28 = scalar_lea.vmem [#allocation8], %s1092_s17 }
  0x5b   : > { %v1433_v0 = vmov 0.0  }
  0x5c   : > { %218 = vst [vmem:[#allocation2 + $0x10] sm:$0xff] %v1433_v0  ;;  %219 = vst [vmem:[#allocation2] sm:$0xff] %v1433_v0 }
  0x5d   : > { %220 = vst [vmem:[#allocation2 + $0x8] sm:$0xff] %v1433_v0 }
  0x5e PF: > { %v1630_v1 = vld [vmem:[%s187_s5 + $0x18] sm:$0xff]  ;;  %v1632_v2 = vld [vmem:[%s187_s5 + $0x8] sm:$0xff]  ;;  %s1434_s24 = smov 126   ;;  %v1638_v3 = vld [vmem:[%s187_s5] sm:$0xff]  ;;  %s1435_s25 = smov 127   ;;  %v1436_v5 = vmov 0.0  }
  0x5f   : > { %442 = vrot.lane.b32.xlu1 %v1630_v1, %s1434_s24  ;;  %438 = vrot.lane.b32.xlu0 %v1632_v2, %s1434_s24  ;;  %v1640_v4 = vld [vmem:[%s187_s5 + $0x10] sm:$0xff]  ;;  %s1437_s7 = smov 110   ;;  %s1438_s4 = smov 92   ;;  %vm1439_vm0 = vmmov 0   ;;  %vm252_vm1 = vcmask 1031168   ;;  %vm237_vm2 = vcmask 1039360  }
  0x60   : > { %1064 = vmatprep.subr.mxu1 %v1436_v5  ;;  %334 = vmatprep.mubr.f32.mxu0 %v1436_v5  ;;  %s1037_s23 = smul.u32 24, %s1403_s15  ;;  %vm266_vm3 = vcmask 195584   ;;  %vm478_vm4 = vcmask 900096   ;;  %vm708_vm5 = vcmask 752640   ;;  %p1048_p1 = scmp.ne.s32.totalorder %s1403_s15, 2 }
  0x61   : > { %1070 = vmatprep.mubr.msk.f32.mxu1 %vm1439_vm0, %v1436_v5 }
  0x62   : > { %s1729_s6 = scalar_lea.vmem [#allocation6], %s1037_s23 }
  0x63   : > { %436 = vrot.lane.b32.xlu1 %v1638_v3, %s1434_s24  ;;  %440 = vrot.lane.b32.xlu0 %v1640_v4, %s1434_s24  ;;  %v262_v48 = vld [vmem:[%s1729_s6] sm:$0xff] }
  0x67   : > { %429 = vrot.lane.b32.xlu1 %v1640_v4, %s1435_s25  ;;  %427 = vrot.lane.b32.xlu0 %v1632_v2, %s1435_s25 }
  0x6b   : > { %425 = vrot.lane.b32.xlu1 %v1638_v3, %s1435_s25  ;;  %431 = vrot.lane.b32.xlu0 %v1630_v1, %s1435_s25 }
  0x6f   : > { %670 = vrot.lane.b32.xlu1 %v1640_v4, %s1434_s24  ;;  %668 = vrot.lane.b32.xlu0 %v1632_v2, %s1434_s24 }
  0x73   : > { %666 = vrot.lane.b32.xlu1 %v1638_v3, %s1434_s24  ;;  %672 = vrot.lane.b32.xlu0 %v1630_v1, %s1434_s24 }
  0x77   : > { %659 = vrot.lane.b32.xlu1 %v1640_v4, %s1435_s25  ;;  %657 = vrot.lane.b32.xlu0 %v1632_v2, %s1435_s25 }
  0x7b   : > { %655 = vrot.lane.b32.xlu1 %v1638_v3, %s1435_s25  ;;  %661 = vrot.lane.b32.xlu0 %v1630_v1, %s1435_s25 }
  0x7f   : > { %248 = vrot.lane.b32.xlu1 %v1640_v4, %s1434_s24  ;;  %246 = vrot.lane.b32.xlu0 %v1632_v2, %s1434_s24 }
  0x83   : > { %231 = vrot.lane.b32.xlu1 %v1632_v2, %s1435_s25  ;;  %244 = vrot.lane.b32.xlu0 %v1638_v3, %s1434_s24 }
  0x87   : > { %229 = vrot.lane.b32.xlu1 %v1638_v3, %s1435_s25  ;;  %233 = vrot.lane.b32.xlu0 %v1640_v4, %s1435_s25 }
  0x8b   : > { %235 = vrot.lane.b32.xlu1 %v1630_v1, %s1435_s25  ;;  %250 = vrot.lane.b32.xlu0 %v1630_v1, %s1434_s24 }
  0x8f   : > { %456 = vrot.lane.b32.xlu1 %v1632_v2, %s1437_s7  ;;  %458 = vrot.lane.b32.xlu0 %v1640_v4, %s1437_s7 }
  0x93   : > { %454 = vrot.lane.b32.xlu1 %v1638_v3, %s1437_s7  ;;  %688 = vrot.lane.b32.xlu0 %v1640_v4, %s1438_s4 }
  0x97   : > { %460 = vrot.lane.b32.xlu1 %v1630_v1, %s1437_s7 }
  0x9b   : > { %686 = vrot.lane.b32.xlu1 %v1632_v2, %s1438_s4 }
  0x9f   : > { %684 = vrot.lane.b32.xlu1 %v1638_v3, %s1438_s4 }
  0xd1   : > { %v443_v6 = vpop.permute.xlu1 %442  ;;  %v439_v7 = vpop.permute.xlu0 %438 }
  0xd2   : > { %476 = vrot.lane.b32.xlu0 %v443_v6, %s1437_s7 }
  0xd5   : > { %v437_v8 = vpop.permute.xlu1 %436  ;;  %v441_v9 = vpop.permute.xlu0 %440 }
  0xd6   : > { %v446_v10 = vsel %vm252_vm1, %v441_v9, %v443_v6  ;;  %v445_v24 = vsel %vm252_vm1, %v439_v7, %v441_v9  ;;  %v444_v27 = vsel %vm252_vm1, %v437_v8, %v439_v7 }
  0xd7   : > { %474 = vrot.lane.b32.xlu1 %v446_v10, %s1437_s7 }
  0xd9   : > { %v430_v11 = vpop.permute.xlu1 %429  ;;  %v428_v12 = vpop.permute.xlu0 %427 }
  0xda   : > { %v434_v13 = vsel %vm237_vm2, %v428_v12, %v430_v11 }
  0xdb   : > { %464 = vrot.lane.b32.xlu1 %v434_v13, %s1437_s7 }
  0xdd   : > { %v426_v14 = vpop.permute.xlu1 %425  ;;  %v432_v15 = vpop.permute.xlu0 %431 }
  0xde   : > { %468 = vrot.lane.b32.xlu0 %v432_v15, %s1437_s7  ;;  %v433_v16 = vsel %vm237_vm2, %v426_v14, %v428_v12  ;;  %v435_v30 = vsel %vm237_vm2, %v430_v11, %v432_v15  ;;  %v1041_v11 = vld [vmem:[%s1729_s6 + $0x8] sm:$0xff] }
  0xdf   : > { %462 = vrot.lane.b32.xlu1 %v433_v16, %s1437_s7 }
  0xe1   : > { %v671_v17 = vpop.permute.xlu1 %670  ;;  %v669_v18 = vpop.permute.xlu0 %668 }
  0xe2   : > { %v675_v34 = vsel %vm252_vm1, %v669_v18, %v671_v17 }
  0xe5   : > { %v667_v19 = vpop.permute.xlu1 %666  ;;  %v673_v20 = vpop.permute.xlu0 %672 }
  0xe6   : > { %706 = vrot.lane.b32.xlu0 %v673_v20, %s1438_s4  ;;  %v676_v21 = vsel %vm252_vm1, %v671_v17, %v673_v20  ;;  %v674_v38 = vsel %vm252_vm1, %v667_v19, %v669_v18 }
  0xe7   : > { %704 = vrot.lane.b32.xlu1 %v676_v21, %s1438_s4 }
  0xe9   : > { %v660_v22 = vpop.permute.xlu1 %659  ;;  %v658_v23 = vpop.permute.xlu0 %657 }
  0xea   : > { %472 = vrot.lane.b32.xlu0 %v445_v24, %s1437_s7  ;;  %v664_v25 = vsel %vm237_vm2, %v658_v23, %v660_v22  ;;  %v1045_v24 = vld [vmem:[%s1729_s6 + $0x10] sm:$0xff] }
  0xeb   : > { %694 = vrot.lane.b32.xlu1 %v664_v25, %s1438_s4 }
  0xed   : > { %v656_v26 = vpop.permute.xlu1 %655  ;;  %v662_v28 = vpop.permute.xlu0 %661 }
  0xee   : > { %470 = vrot.lane.b32.xlu0 %v444_v27, %s1437_s7  ;;  %v663_v29 = vsel %vm237_vm2, %v656_v26, %v658_v23  ;;  %v665_v43 = vsel %vm237_vm2, %v660_v22, %v662_v28 }
  0xef   : > { %692 = vrot.lane.b32.xlu1 %v663_v29, %s1438_s4 }
  0xf1   : > { %v249_v31 = vpop.permute.xlu1 %248  ;;  %v247_v32 = vpop.permute.xlu0 %246 }
  0xf2   : > { %466 = vrot.lane.b32.xlu0 %v435_v30, %s1437_s7  ;;  %v254_v33 = vsel %vm252_vm1, %v247_v32, %v249_v31 }
  0xf3   : > { %690 = vrot.lane.b32.xlu1 %v1630_v1, %s1438_s4  ;;  %296 = vmatprep.subr.mxu0 %v254_v33 }
  0xf5   : > { %v232_v35 = vpop.permute.xlu1 %231  ;;  %v245_v36 = vpop.permute.xlu0 %244 }
  0xf6   : > { %702 = vrot.lane.b32.xlu0 %v675_v34, %s1438_s4  ;;  %v253_v37 = vsel %vm252_vm1, %v245_v36, %v247_v32  ;;  %v263_v36 = vld [vmem:[#allocation2 + $0x10] sm:$0xff] }
  0xf7   : > { %297 = vmatpush1.msra.mxu0 %v253_v37  ;;  %v264_v37 = vld [vmem:[#allocation2] sm:$0xff] }
  0xf9   : > { %v230_v39 = vpop.permute.xlu1 %229  ;;  %v234_v40 = vpop.permute.xlu0 %233 }
  0xfa   : > { %700 = vrot.lane.b32.xlu0 %v674_v38, %s1438_s4  ;;  %v239_v41 = vsel %vm237_vm2, %v232_v35, %v234_v40  ;;  %v238_v42 = vsel %vm237_vm2, %v230_v39, %v232_v35 }
  0xfb   : > { %298 = vmatprep.subr.mxu0 %v239_v41 }
  0xfc   : > { %299 = vmatpush1.msra.mxu0 %v238_v42 }
  0xfd   : > { %v236_v44 = vpop.permute.xlu1 %235  ;;  %v251_v45 = vpop.permute.xlu0 %250  ;;  %300 = vmatprep.subr.mxu0 %v1632_v2 }
  0xfe   : > { %696 = vrot.lane.b32.xlu0 %v665_v43, %s1438_s4  ;;  %v255_v46 = vsel %vm252_vm1, %v249_v31, %v251_v45  ;;  %v240_v47 = vsel %vm237_vm2, %v234_v40, %v236_v44  ;;  %301 = vmatpush1.msra.mxu0 %v1638_v3  ;;  %v265_v40 = vld [vmem:[#allocation2 + $0x8] sm:$0xff] }
  0xff   : > { %1065 = vmatpush3.msra.mxu1 %v255_v46  ;;  %1038 = vmatmul.mubr.msk.f32.vlgmr.msra.gmra.mxu0 %vm266_vm3, %v262_v48 }
 0x100   : > { %1066 = vmatprep.subr.mxu1 %v1436_v5  ;;  %564 = vmatprep.mubr.f32.mxu0 %v1436_v5 }
 0x101   : > { %1067 = vmatpush3.msra.mxu1 %v240_v47  ;;  %v457_v49 = vpop.permute.xlu1 %456  ;;  %v459_v52 = vpop.permute.xlu0 %458 }
 0x102   : > { %698 = vrot.lane.b32.xlu0 %v662_v28, %s1438_s4  ;;  %1068 = vmatprep.subr.mxu1 %v1436_v5  ;;  %v480_v10 = vsel %vm478_vm4, %v457_v49, %v459_v52 }
 0x103   : > { %1069 = vmatpush3.msra.mxu1 %v1640_v4 }
 0x104   : > { %1073 = vmatprep.subr.mxu1 %v1436_v5  ;;  %1071 = vmatmul.mubr.msk.f32.vlgmr.msra.gmra.mxu1 %vm266_vm3, %v262_v48 }
 0x105   : > { %1079 = vmatprep.mubr.msk.f32.mxu1 %vm1439_vm0, %v1436_v5  ;;  %v455_v50 = vpop.permute.xlu1 %454  ;;  %v1743_v54 = vpop.permute.xlu0 %688 }
 0x106   : > { %v479_v12 = vsel %vm478_vm4, %v455_v50, %v457_v49 }
 0x109   : > { %v461_v51 = vpop.permute.xlu1 %460 }
 0x10a   : > { %v481_v9 = vsel %vm478_vm4, %v459_v52, %v461_v51 }
 0x10d   : > { %v687_v53 = vpop.permute.xlu1 %686 }
 0x10e   : > { %v710_v23 = vsel %vm708_vm5, %v687_v53, %v1743_v54 }
 0x111   : > { %v685_v55 = vpop.permute.xlu1 %684 }
 0x112   : > { %v709_v25 = vsel %vm708_vm5, %v685_v55, %v687_v53 }
 0x144   : > { %v477_v56 = vpop.permute.xlu0 %476 }
 0x149   : > { %v475_v57 = vpop.permute.xlu1 %474 }
 0x14a   : > { %v487_v58 = vsel %vm478_vm4, %v475_v57, %v477_v56 }
 0x14b   : > { %1074 = vmatpush3.msra.mxu1 %v487_v58 }
 0x14c   : > { %1075 = vmatprep.subr.mxu1 %v1436_v5 }
 0x14d   : > { %v465_v60 = vpop.permute.xlu1 %464 }
 0x150   : > { %v469_v59 = vpop.permute.xlu0 %468 }
 0x151   : > { %v463_v0 = vpop.permute.xlu1 %462 }
 0x152   : > { %v482_v8 = vsel %vm478_vm4, %v463_v0, %v465_v60 }
 0x158   : > { %v707_v61 = vpop.permute.xlu0 %706 }
 0x159   : > { %v705_v3 = vpop.permute.xlu1 %704 }
 0x15a   : > { %v717_v16 = vsel %vm708_vm5, %v705_v3, %v707_v61 }
 0x15c   : > { %v473_v62 = vpop.permute.xlu0 %472 }
 0x15d   : > { %v486_v63 = vsel %vm478_vm4, %v473_v62, %v475_v57  ;;  %v695_v13 = vpop.permute.xlu1 %694 }
 0x15e   : > { %526 = vmatprep.subr.mxu0 %v486_v63 }
 0x160   : > { %v471_v1 = vpop.permute.xlu0 %470 }
 0x161   : > { %v485_v2 = vsel %vm478_vm4, %v471_v1, %v473_v62  ;;  %v693_v19 = vpop.permute.xlu1 %692 }
 0x162   : > { %527 = vmatpush1.msra.mxu0 %v485_v2  ;;  %v712_v22 = vsel %vm708_vm5, %v693_v19, %v695_v13 }
 0x164   : > { %v467_v4 = vpop.permute.xlu0 %466 }
 0x165   : > { %v484_v6 = vsel %vm478_vm4, %v467_v4, %v469_v59  ;;  %v483_v7 = vsel %vm478_vm4, %v465_v60, %v467_v4  ;;  %v691_v26 = vpop.permute.xlu1 %690 }
 0x166   : > { %528 = vmatprep.subr.mxu0 %v483_v7  ;;  %1076 = vmatpush3.msra.mxu1 %v484_v6  ;;  %v711_v29 = vsel %vm708_vm5, %v1743_v54, %v691_v26 }
 0x167   : > { %529 = vmatpush1.msra.mxu0 %v482_v8  ;;  %1077 = vmatprep.subr.mxu1 %v1436_v5 }
 0x168   : > { %530 = vmatprep.subr.mxu0 %v480_v10  ;;  %1078 = vmatpush3.msra.mxu1 %v481_v9  ;;  %v703_v14 = vpop.permute.xlu0 %702 }
 0x169   : > { %531 = vmatpush1.msra.mxu0 %v479_v12  ;;  %1082 = vmatprep.subr.mxu1 %v1436_v5  ;;  %v716_v15 = vsel %vm708_vm5, %v703_v14, %v705_v3 }
 0x16a   : > { %1080 = vmatmul.mubr.msk.f32.vlgmr.msra.gmra.mxu1 %vm266_vm3, %v1041_v11  ;;  %756 = vmatprep.subr.mxu0 %v716_v15 }
 0x16b   : > { %1083 = vmatpush3.msra.mxu1 %v717_v16  ;;  %1042 = vmatmul.mubr.msk.f32.vlgmr.msra.gmra.mxu0 %vm266_vm3, %v1041_v11 }
 0x16c   : > { %v701_v17 = vpop.permute.xlu0 %700  ;;  %794 = vmatprep.mubr.f32.mxu0 %v1436_v5  ;;  %1084 = vmatprep.subr.mxu1 %v1436_v5 }
 0x16d   : > { %v715_v18 = vsel %vm708_vm5, %v701_v17, %v703_v14  ;;  %1088 = vmatprep.mubr.msk.f32.mxu1 %vm1439_vm0, %v1436_v5 }
 0x16e   : > { %757 = vmatpush1.msra.mxu0 %v715_v18 }
 0x170   : > { %v697_v20 = vpop.permute.xlu0 %696 }
 0x171   : > { %v713_v21 = vsel %vm708_vm5, %v695_v13, %v697_v20 }
 0x172   : > { %758 = vmatprep.subr.mxu0 %v713_v21 }
 0x173   : > { %759 = vmatpush1.msra.mxu0 %v712_v22 }
 0x174   : > { %760 = vmatprep.subr.mxu0 %v710_v23  ;;  %v699_v27 = vpop.permute.xlu0 %698 }
 0x175   : > { %v714_v28 = vsel %vm708_vm5, %v697_v20, %v699_v27  ;;  %761 = vmatpush1.msra.mxu0 %v709_v25 }
 0x176   : > { %1046 = vmatmul.mubr.msk.f32.vlgmr.msra.gmra.mxu0 %vm266_vm3, %v1045_v24  ;;  %1085 = vmatpush3.msra.mxu1 %v714_v28 }
 0x177   : > { %1086 = vmatprep.subr.mxu1 %v1436_v5 }
 0x178   : > { %1087 = vmatpush3.msra.mxu1 %v711_v29 }
 0x179   : > { %1089 = vmatmul.mubr.msk.f32.vlgmr.msra.gmra.mxu1 %vm266_vm3, %v1045_v24 }
 0x1bf   : > { %v336_v32 = vpop.f32.mrf.mxu0 }
 0x1c0   : > { %v411_v39 = vadd.f32 %v336_v32, %v263_v36 }
 0x1c1   : > { %v338_v34 = vpop.f32.mrf.mxu0 }
 0x1c2   : > { %v412_v41 = vadd.f32 %v338_v34, %v264_v37 }
 0x1c4   : > { %v407_v30 = vpop.f32.mrf.mxu1 }
 0x1c5   : > { %v413_v42 = vadd.f32 %v407_v30, %v265_v40 }
 0x1c6   : > { %v1072_v31 = vpop.f32.mrf.mxu1 }
 0x22a   : > { %v637_v33 = vpop.f32.mrf.mxu1 }
 0x22b   : > { %v566_v38 = vpop.f32.mrf.mxu0  ;;  %v643_v47 = vadd.f32 %v637_v33, %v413_v42 }
 0x22c   : > { %v1081_v35 = vpop.f32.mrf.mxu1  ;;  %v641_v44 = vadd.f32 %v566_v38, %v411_v39 }
 0x22d   : > { %v568_v43 = vpop.f32.mrf.mxu0 }
 0x22e   : > { %v642_v5 = vadd.f32 %v568_v43, %v412_v41 }
 0x236   : > { %v796_v45 = vpop.f32.mrf.mxu0 }
 0x237   : > { %v871_v46 = vadd.f32 %v796_v45, %v641_v44 }
 0x238   : > { %v798_v48 = vpop.f32.mrf.mxu0  ;;  %880 = sbr.rel (%p1048_p1) target bundleno = 581 (0x245), region = 44 }
 0x239   : > { %874 = vst [vmem:[#allocation2 + $0x10] sm:$0xff] %v871_v46  ;;  %v872_v49 = vadd.f32 %v798_v48, %v642_v5  ;;  %v867_v50 = vpop.f32.mrf.mxu1 }
 0x23a   : > { %v873_v51 = vadd.f32 %v867_v50, %v643_v47 }
 0x23b   : > { %875 = vst [vmem:[#allocation2] sm:$0xff] %v872_v49  ;;  %v1090_v52 = vpop.f32.mrf.mxu1 }
 0x23c   : > { %876 = vst [vmem:[#allocation2 + $0x8] sm:$0xff] %v873_v51 }
 0x240   : > { %v881_v53 = vld [vmem:[#allocation2 + $0x10] sm:$0xff] }
 0x241   : > { %884 = vst [vmem:[%s1627_s28] sm:$0xff] %v881_v53 }
 0x242   : > { %v882_v54 = vld [vmem:[#allocation2] sm:$0xff] }
 0x243   : > { %v883_v55 = vld [vmem:[#allocation2 + $0x8] sm:$0xff]  ;;  %885 = vst [vmem:[%s1627_s28 + $0x8] sm:$0xff] %v882_v54 }
 0x244   : > { %886 = vst [vmem:[%s1627_s28 + $0x10] sm:$0xff] %v883_v55 }
 0x245 PF: > { %s1884_s27 = sld [smem:[#allocation13_spill]]  ;;  %s906_s26 = sshll.u32 %s1627_s28, 4  ;;  %s907_s26 = int_to_ptr.vmem [resolvable:$true] %s906_s26 }
 0x246   : > { %s1885_s2 = sld [smem:[#allocation14_spill]]  ;;  %s888_s17 = scalar_lea.sflag [#allocation5], %s209_s16 }
 0x247   : > { %s1886_s9 = sld [smem:[#allocation17_spill]]  ;;  %s1287_s24 = scalar_lea.vmem %s907_s26, 384 }
 0x248   : > { %s1887_s3 = sld [smem:[#allocation22_spill]]  ;;  %p1288_p4 = scmp.ne.s32.totalorder %s907_s26, %s1287_s24 }
 0x249   : > { %s1440_s25 = smov [#allocation8]  }
 0x24a   : > { %s1291_s7 = sshll.u32 %s1440_s25, 4  ;;  %s1292_s7 = int_to_ptr.vmem [resolvable:$false] %s1291_s7 }
 0x24b   : > { %s1093_s18 = smul.u32 3, %s1884_s27  ;;  %s1293_s4 = scalar_lea.vmem %s1292_s7, 768 }
 0x24c   : > { %s1094_s1 = smul.u32 24, %s1885_s2  ;;  %p1294_p8 = scmp.lt.s32.totalorder %s907_s26, %s1292_s7 }
 0x24d   : > { %p1888_p3 = scmp.ne.s32.totalorder %s1886_s9, 0  ;;  %p1295_p6 = scmp.lt.s32.totalorder %s1293_s4, %s1287_s24 }
 0x24e   : > { %s902_s15 = sadd.s32 %s1094_s1, %s1093_s18 }
 0x24f   : > { %s1049_s8 = sshll.u32 %s902_s15, 7  ;;  %p1289_p5 = pnand %p1288_p4, %p1888_p3 }
 0x250   : > { %s904_s5 = scalar_lea.hbm %s1887_s3, %s1049_s8  ;;  %p1296_p9 = por %p1295_p6, %p1294_p8 }
 0x251   : > { %p1290_p7 = pneg %p1289_p5 }
 0x253   : > { %p1297_p10 = pnand %p1296_p9, %p1290_p7 }
 0x255   : > { %1300 = shalt.err (!%p1297_p10)
}
 0x256   : > { %s1301_s28 = scalar_lea.hbm %s904_s5, 384  ;;  %s1305_s6 = scalar_lea.hbm %s1887_s3, 6144 }
 0x257   : > { %p1302_p12 = scmp.ne.s32.totalorder %s904_s5, %s1301_s28  ;;  %p1306_p2 = scmp.lt.s32.totalorder %s904_s5, %s1887_s3 }
 0x258   : > { %p1307_p11 = scmp.lt.s32.totalorder %s1305_s6, %s1301_s28 }
 0x259   : > { %p1303_p13 = pnand %p1302_p12, %p1888_p3 }
 0x25a   : > { %p1308_p1 = por %p1307_p11, %p1306_p2 }
 0x25b   : > { %p1304_p0 = pneg %p1303_p13 }
 0x25d   : > { %p1309_p4 = pnand %p1308_p1, %p1304_p0 }
 0x25f   : > { %1312 = shalt.err (!%p1309_p4)
}
 0x260   : > { %1101 = dma.vmem_to_hbm [thread:$0]  (%p1888_p3), %s907_s26, 384, %s904_s5, %s888_s17  }
 0x261 PF: > { %s1889_s18 = sld [smem:[#allocation12_spill]]  ;;  %p1118_p5 = scmp.ge.s32.totalorder %s1427_s21, 2 }
 0x262   : > { %s1890_s1 = sld [smem:[#allocation18_spill]] }
 0x267   : > { %s918_s15 = sand.u32 1, %s1889_s18  }
 0x268   : > { %p1891_p7 = scmp.ne.s32.totalorder %s1890_s1, 0  ;;  %s919_s8 = scalar_lea.sflag [#allocation5], %s918_s15 }
 0x26a   : > { %p1112_p8 = pnand %p1118_p5, %p1891_p7 }
 0x26c   : > { %p1113_p6 = pneg %p1112_p8 }
 0x26e   : > { %1374 = dma.done.wait (%p1113_p6), %s919_s8, 384  }
 0x26f   : > { %1376 = vsyncadd (%p1113_p6), %s919_s8, 4294966912  ;;  %s19_s21 = sadd.s32 1, %s1427_s21   ;;  %s1893_s26 = smov %s1593_s12 }
 0x270   : > { %p1808_p9 = scmp.ge.s32.totalorder %s19_s21, 50   ;;  %s1894_s15 = sld [smem:[#allocation15_spill]] }
 0x271   : > { %s1895_s16 = sld [smem:[#allocation16_spill]]  ;;  %s1898_s9 = smov %s1383_s10 }
 0x272   : > { %s1896_s18 = sld [smem:[#allocation19_spill]]  ;;  %s1899_s10 = smov %s1387_s11 }
 0x273   : > { %s1897_s30 = sld [smem:[#allocation20_spill]]  ;;  %s1900_s11 = smov %s1596_s19 }
 0x274   : > { %s1901_s12 = smov %s1395_s13  ;;  %s1902_s13 = smov %s1399_s14 }
 0x275   : > { %s1903_s14 = smov %s1893_s26  ;;  %s1904_s17 = smov %s1423_s20 }
 0x276   : > { %s1906_s20 = smov %s1916_s22  ;;  %18 = sbr.rel (!%p1808_p9) target bundleno = 14 (0xe), region = 88 }
 0x279   : > { %s1905_s19 = smov %s1897_s30 }
 0x27b   :  { %924 = vsyncpa [#allocation4], 1 }
 0x27c   :  { %926 = vsyncpa [#allocation4 + $0x1], 1 }
 0x27d   :  { %927 = vsyncpa [#allocation7], 1 }
 0x27e   :  { %928 = vsyncpa [#allocation5], 1 }
 0x27f   :  { %930 = vsyncpa [#allocation5 + $0x1], 1 }

</bundles_post_ra>
